<compile_context>
chip_gen: v7x
topology: tpu7x:2x2x1
jax: 0.10.0
libtpu: 0.0.40
codegen_flags: <defaults>
</compile_context>

<pallas_src>
import math

import jax
import jax.numpy as jnp
from jax.experimental import pallas as pl
from jax.experimental.pallas import tpu as pltpu


def _round_up(a, b):
    return ((a + b - 1) // b) * b


def _make_constants(metadata):
    """metadata[l] = multiplicity of angular momentum l (per row).

    Returns:
      seg     : (rep_dim, n_irreps)  one-hot "component d belongs to irrep i".
      seg_t   : (n_irreps, rep_dim)  transpose, pre-oriented for the expand dot.
      comp_l0 : (1, rep_dim) float mask, 1.0 where the component's irrep has l==0.
      l0      : (1, n_irreps) float mask, 1.0 where the irrep has l==0.
    """
    comp_irrep = []
    l_of_irrep = []
    irrep = 0
    for l, mult in enumerate(metadata):
        for _ in range(mult):
            comp_irrep.extend([irrep] * (2 * l + 1))
            l_of_irrep.append(l)
            irrep += 1
    rep_dim = len(comp_irrep)
    n_irreps = irrep

    seg = jnp.zeros((rep_dim, n_irreps), jnp.float32)
    seg = seg.at[jnp.arange(rep_dim), jnp.asarray(comp_irrep)].set(1.0)
    seg_t = seg.T

    l0 = jnp.asarray([[1.0 if l == 0 else 0.0 for l in l_of_irrep]],
                     jnp.float32)                                    # (1, n_irreps)
    comp_l0 = jnp.asarray([[1.0 if l_of_irrep[i] == 0 else 0.0
                            for i in comp_irrep]], jnp.float32)      # (1, rep_dim)
    return seg, seg_t, comp_l0, l0


def _sigmoid_gate_kernel(x_ref, seg_ref, segt_ref, compl0_ref, l0_ref, o_ref):
    # x: (tile_rows, rep_dim), native dtype (f32 or bf16 — no full-tile cast).
    x = x_ref[...]

    # Fused per-irrep reduction (single MXU dot): l=0 components contribute
    # their signed value, l>0 components their square.  Accumulate in f32.
    y = jnp.where(compl0_ref[...] > 0.0, x, x * x)                   # VPU, native dtype
    mixed = jnp.dot(y, seg_ref[...],
                    preferred_element_type=jnp.float32)              # (T, n_irreps) f32

    # invariant(): l=0 stays signed, l>0 -> L2 norm.  max() keeps the unused
    # branch NaN-free (also for garbage in a masked ragged last block).
    inv = jnp.where(l0_ref[...] > 0.0, mixed,
                    jnp.sqrt(jnp.maximum(mixed, 0.0)))
    gate = jax.nn.sigmoid(inv)                                       # EUP, f32, small

    # scalar_mul(): broadcast each irrep's gate back over its m-components.
    expand = jnp.dot(gate.astype(segt_ref.dtype), segt_ref[...],
                     preferred_element_type=o_ref.dtype)             # (T, rep_dim)
    o_ref[...] = (x * expand).astype(o_ref.dtype)


def sigmoid_gate(x, metadata, *, tile_rows=4096):
    """x: [..., rep_dim] SphericalTensor data; metadata[l] = multiplicity of l."""
    seg, seg_t, comp_l0, l0 = _make_constants(metadata)
    rep_dim, n_irreps = seg.shape
    assert x.shape[-1] == rep_dim, (x.shape, rep_dim)

    lead = x.shape[:-1]
    rows = math.prod(lead) if lead else 1

    # Natural layout: merge leading dims (free, no data movement), no transpose,
    # no padding.  Weight constants are cast to the input dtype (bf16 fast path).
    x2 = x.reshape(rows, rep_dim)
    seg = seg.astype(x.dtype)
    seg_t = seg_t.astype(x.dtype)

    # Tile: sublane-aligned, clamped to the problem size; ragged last block is
    # handled by Pallas boundary masking (grid = cdiv).
    tile_rows = max(8, (tile_rows // 8) * 8)
    tile_rows = min(tile_rows, _round_up(rows, 8))
    n_steps = pl.cdiv(rows, tile_rows)
    if n_steps == 1 and rows >= 2048:
        # Enough work to split across v7x's two TensorCores ("parallel" axis).
        tile_rows = _round_up(pl.cdiv(rows, 2), 8)
        n_steps = pl.cdiv(rows, tile_rows)

    out = pl.pallas_call(
        _sigmoid_gate_kernel,
        out_shape=jax.ShapeDtypeStruct((rows, rep_dim), x.dtype),
        grid_spec=pltpu.PrefetchScalarGridSpec(
            num_scalar_prefetch=0,
            grid=(n_steps,),
            in_specs=[
                pl.BlockSpec((tile_rows, rep_dim), lambda i: (i, 0)),
                pl.BlockSpec((rep_dim, n_irreps), lambda i: (0, 0)),
                pl.BlockSpec((n_irreps, rep_dim), lambda i: (0, 0)),
                pl.BlockSpec((1, rep_dim), lambda i: (0, 0)),
                pl.BlockSpec((1, n_irreps), lambda i: (0, 0)),
            ],
            out_specs=pl.BlockSpec((tile_rows, rep_dim), lambda i: (i, 0)),
        ),
        compiler_params=pltpu.CompilerParams(
            dimension_semantics=("parallel",)),
    )(x2, seg, seg_t, comp_l0, l0)

    return out.reshape(*lead, rep_dim)


def _reference(x, metadata):
    """Plain-JAX reference for the same semantics (f32)."""
    seg, seg_t, comp_l0, l0 = _make_constants(metadata)
    y = jnp.where(comp_l0[0] > 0.0, x, x * x)
    mixed = jnp.einsum("...d,dn->...n", y, seg)
    inv = jnp.where(l0[0] > 0.0, mixed, jnp.sqrt(jnp.maximum(mixed, 0.0)))
    gate = jax.nn.sigmoid(inv)
    return x * jnp.einsum("...n,nd->...d", gate, seg_t)


if __name__ == "__main__":
    # Small SphericalTensor: irreps (l=0)x2, (l=1)x2, (l=2)x1 -> rep_dim = 13.
    metadata = (2, 2, 1)
    batch, nodes, rep_dim = 2, 16, 2 * 1 + 2 * 3 + 1 * 5

    key = jax.random.PRNGKey(0)
    x = jax.random.normal(key, (batch, nodes, rep_dim), dtype=jnp.float32)

    # f32 path (v5e-safe).
    out = sigmoid_gate(x, metadata)
    out = jax.block_until_ready(out)
    ref = _reference(x, metadata)
    assert out.shape == x.shape and out.dtype == x.dtype
    assert jnp.allclose(out, ref, atol=1e-5, rtol=1e-5)

    # bf16 fast path (v6e/v7x): no full-tile casts inside the kernel.
    x_bf = x.astype(jnp.bfloat16)
    out_bf = jax.block_until_ready(sigmoid_gate(x_bf, metadata))
    ref_bf = _reference(x_bf.astype(jnp.float32), metadata)
    assert out_bf.shape == x.shape and out_bf.dtype == jnp.bfloat16
    assert jnp.allclose(out_bf.astype(jnp.float32), ref_bf, atol=5e-2, rtol=5e-2)

    print("KERNEL_OK")
</pallas_src>

<mosaic_0001>
module attributes {stable_mosaic.version = 11 : i64} {
  func.func @_sigmoid_gate_kernel(%arg0: i32, %arg1: memref<32x13xf32, #tpu.memory_space<vmem>>, %arg2: memref<13x5xf32, #tpu.memory_space<vmem>>, %arg3: memref<5x13xf32, #tpu.memory_space<vmem>>, %arg4: memref<1x13xf32, #tpu.memory_space<vmem>>, %arg5: memref<1x5xf32, #tpu.memory_space<vmem>>, %arg6: memref<32x13xf32, #tpu.memory_space<vmem>>) attributes {dimension_semantics = [#tpu.dimension_semantics<parallel>], iteration_bounds = array<i64: 1>, scalar_prefetch = 0 : i64, scratch_operands = 0 : i64, tpu.core_type = #tpu.core_type<tc>, window_params = [{transform_indices = @transform_0, window_bounds = array<i64: 32, 13>}, {pipeline_mode = #tpu.pipeline_mode<synchronous>, transform_indices = @transform_1, window_bounds = array<i64: 13, 5>}, {pipeline_mode = #tpu.pipeline_mode<synchronous>, transform_indices = @transform_2, window_bounds = array<i64: 5, 13>}, {pipeline_mode = #tpu.pipeline_mode<synchronous>, transform_indices = @transform_3, window_bounds = array<i64: 1, 13>}, {pipeline_mode = #tpu.pipeline_mode<synchronous>, transform_indices = @transform_4, window_bounds = array<i64: 1, 5>}, {transform_indices = @transform_5, window_bounds = array<i64: 32, 13>}]} {
    %c0 = arith.constant 0 : index
    %c0_0 = arith.constant 0 : index
    %0 = vector.load %arg1[%c0, %c0_0] : memref<32x13xf32, #tpu.memory_space<vmem>>, vector<32x13xf32>
    %c0_1 = arith.constant 0 : index
    %c0_2 = arith.constant 0 : index
    %1 = vector.load %arg4[%c0_1, %c0_2] : memref<1x13xf32, #tpu.memory_space<vmem>>, vector<1x13xf32>
    %cst = arith.constant 0.000000e+00 : f32
    %2 = vector.broadcast %cst : f32 to vector<1x13xf32>
    %3 = arith.cmpf ogt, %1, %2 : vector<1x13xf32>
    %4 = arith.mulf %0, %0 : vector<32x13xf32>
    %5 = vector.shape_cast %3 : vector<1x13xi1> to vector<1x13xi1>
    %6 = vector.broadcast %5 : vector<1x13xi1> to vector<32x13xi1>
    %7 = arith.select %6, %0, %4 : vector<32x13xi1>, vector<32x13xf32>
    %c0_3 = arith.constant 0 : index
    %c0_4 = arith.constant 0 : index
    %8 = vector.load %arg2[%c0_3, %c0_4] : memref<13x5xf32, #tpu.memory_space<vmem>>, vector<13x5xf32>
    %cst_5 = arith.constant dense<0.000000e+00> : vector<32x5xf32>
    %9 = tpu.matmul %7, %8, %cst_5 {dimension_numbers = #tpu.dot_dimension_numbers<[1], [0], [0], [1], [0, 0, 1, 1], [], []>} : vector<32x13xf32>, vector<13x5xf32>, vector<32x5xf32> -> vector<32x5xf32>
    %c0_6 = arith.constant 0 : index
    %c0_7 = arith.constant 0 : index
    %10 = vector.load %arg5[%c0_6, %c0_7] : memref<1x5xf32, #tpu.memory_space<vmem>>, vector<1x5xf32>
    %cst_8 = arith.constant 0.000000e+00 : f32
    %11 = vector.broadcast %cst_8 : f32 to vector<1x5xf32>
    %12 = arith.cmpf ogt, %10, %11 : vector<1x5xf32>
    %cst_9 = arith.constant 0.000000e+00 : f32
    %13 = vector.broadcast %cst_9 : f32 to vector<32x5xf32>
    %14 = arith.maximumf %9, %13 : vector<32x5xf32>
    %15 = math.sqrt %14 : vector<32x5xf32>
    %16 = vector.shape_cast %12 : vector<1x5xi1> to vector<1x5xi1>
    %17 = vector.broadcast %16 : vector<1x5xi1> to vector<32x5xi1>
    %18 = arith.select %17, %9, %15 : vector<32x5xi1>, vector<32x5xf32>
    %19 = arith.negf %18 : vector<32x5xf32>
    %20 = math.exp %19 : vector<32x5xf32>
    %cst_10 = arith.constant 1.000000e+00 : f32
    %21 = vector.broadcast %cst_10 : f32 to vector<32x5xf32>
    %22 = arith.addf %21, %20 : vector<32x5xf32>
    %23 = arith.divf %21, %22 : vector<32x5xf32>
    %c0_11 = arith.constant 0 : index
    %c0_12 = arith.constant 0 : index
    %24 = vector.load %arg3[%c0_11, %c0_12] : memref<5x13xf32, #tpu.memory_space<vmem>>, vector<5x13xf32>
    %cst_13 = arith.constant dense<0.000000e+00> : vector<32x13xf32>
    %25 = tpu.matmul %23, %24, %cst_13 {dimension_numbers = #tpu.dot_dimension_numbers<[1], [0], [0], [1], [0, 0, 1, 1], [], []>} : vector<32x5xf32>, vector<5x13xf32>, vector<32x13xf32> -> vector<32x13xf32>
    %26 = arith.mulf %0, %25 : vector<32x13xf32>
    %c0_14 = arith.constant 0 : index
    %c0_15 = arith.constant 0 : index
    %27 = vector.load %arg6[%c0_14, %c0_15] : memref<32x13xf32, #tpu.memory_space<vmem>>, vector<32x13xf32>
    tpu.vector_store %arg6[%c0_14, %c0_15], %26 {strides = array<i32>} : memref<32x13xf32, #tpu.memory_space<vmem>>, vector<32x13xf32>,
    return
  }
  func.func @transform_0(%arg0: i32) -> (i32, i32) {
    %c0_i32 = arith.constant 0 : i32
    %c0_i32_0 = arith.constant 0 : i32
    return %arg0, %c0_i32 : i32, i32
  }
  func.func @transform_1(%arg0: i32) -> (i32, i32) {
    %c0_i32 = arith.constant 0 : i32
    %c0_i32_0 = arith.constant 0 : i32
    %c0_i32_1 = arith.constant 0 : i32
    return %c0_i32, %c0_i32_0 : i32, i32
  }
  func.func @transform_2(%arg0: i32) -> (i32, i32) {
    %c0_i32 = arith.constant 0 : i32
    %c0_i32_0 = arith.constant 0 : i32
    %c0_i32_1 = arith.constant 0 : i32
    return %c0_i32, %c0_i32_0 : i32, i32
  }
  func.func @transform_3(%arg0: i32) -> (i32, i32) {
    %c0_i32 = arith.constant 0 : i32
    %c0_i32_0 = arith.constant 0 : i32
    %c0_i32_1 = arith.constant 0 : i32
    return %c0_i32, %c0_i32_0 : i32, i32
  }
  func.func @transform_4(%arg0: i32) -> (i32, i32) {
    %c0_i32 = arith.constant 0 : i32
    %c0_i32_0 = arith.constant 0 : i32
    %c0_i32_1 = arith.constant 0 : i32
    return %c0_i32, %c0_i32_0 : i32, i32
  }
  func.func @transform_5(%arg0: i32) -> (i32, i32) {
    %c0_i32 = arith.constant 0 : i32
    %c0_i32_0 = arith.constant 0 : i32
    return %arg0, %c0_i32 : i32, i32
  }
}

</mosaic_0001>

<bundles_post_ra>
// kernel: tpu_custom_call.1
= control target key start
LH: loop header
LB: loop body
LE: loop exit
PB: predicated region body
PF: predicated region fallthrough
CT: control target
= control target key end

     0   :  { %vm55_vm0 = vcmask 1044480   ;;  %v31_v0 = vlaneseq  ;;  %vm401_vm1 = vmmov 1   ;;  %v402_v9 = vmov 0   ;;  %s511_s1 = inlined_call_operand.vmem [shape: f32[13,5], index: 1, kind: input, shape index: {}]   ;;  %s512_s0 = inlined_call_operand.vmem [shape: f32[32,13], index: 0, kind: input, shape index: {}]   ;;  %s513_s3 = inlined_call_operand.vmem [shape: f32[1,13], index: 3, kind: input, shape index: {}]   ;;  %s514_s2 = inlined_call_operand.vmem [shape: f32[5,13], index: 2, kind: input, shape index: {}]   ;;  %s515_s4 = inlined_call_operand.vmem [shape: f32[1,5], index: 4, kind: input, shape index: {}]   ;;  %s516_s5 = inlined_call_operand.vmem [shape: f32[32,13], index: 5, kind: output, shape index: {}]  }
   0x1   :  { %v40_v1 = vld [vmem:[%s511_s1] sm:$0xff]  ;;  %v41_v2 = vld [vmem:[%s511_s1 + $0x8] sm:$0x1f]  ;;  %vm370_vm2 = vmpackc.low %vm55_vm0, %vm401_vm1  ;;  %vm42_vm4 = vcmask 105472  }
   0x2   :  { %v369_v3 = vpack.c.bf16 %v41_v2, %v40_v1  ;;  %v443_v4 = vld [vmem:[%s512_s0] sm:$0xff]  ;;  %v32_v6 = vshrl.u32 %v31_v0, 7  ;;  %v451_v7 = vld [vmem:[%s512_s0 + $0x8] sm:$0xff]  ;;  %v456_v8 = vld [vmem:[%s512_s0 + $0x10] sm:$0xff] }
   0x3   :  { %v24_v5 = vld [vmem:[%s513_s3] sm:$0x1]  ;;  %v26_v12 = vmul.f32 %v443_v4, %v443_v4  ;;  %v27_v13 = vmul.f32 %v451_v7, %v451_v7  ;;  %v28_v14 = vmul.f32 %v456_v8, %v456_v8  ;;  %v467_v15 = vld [vmem:[%s512_s0 + $0x18] sm:$0xff] }
   0x4   :  { %vm25_vm3 = vcmp.gt.f32.partialorder %v24_v5, 0.0  ;;  %371 = vmatprep.subr.msk.bf16.mxu0 %vm370_vm2, %v369_v3  ;;  %v33_v11 = vsub.s32 0, %v32_v6  ;;  %v29_v17 = vmul.f32 %v467_v15, %v467_v15  ;;  %v212_v22 = vld [vmem:[%s514_s2] sm:$0x1f] }
   0x5   :  { %v30_v10 = vsel %vm25_vm3, 1, %v402_v9  ;;  %374 = vmatpush3.bf16.msk.msra.mxu0 %vm370_vm2, %v369_v3  ;;  %361 = vmatprep.subr.msk.mxu1 %vm55_vm0, %v212_v22  ;;  %v144_v26 = vld [vmem:[%s515_s4] sm:$0x1] }
   0x6   :  { %v34_v16 = vrot.slane %v30_v10, %v33_v11  ;;  %362 = vmatpush3.msk.msra.mxu1 %vm55_vm0, %v212_v22  ;;  %vm145_vm6 = vcmp.gt.f32.partialorder %v144_v26, 0.0  ;;  %vm213_vm0 = vcmask 39936  }
   0x7   :  { %v178_v32 = vsel %vm145_vm6, 1, %v402_v9 }
   0x8   :  { %vm35_vm5 = vcmp.eq.s32.totalorder %v34_v16, 1  ;;  %v182_v33 = vrot.slane %v178_v32, %v33_v11 }
   0x9   :  { %v36_v18 = vsel %vm35_vm5, %v443_v4, %v26_v12  ;;  %v37_v19 = vsel %vm35_vm5, %v451_v7, %v27_v13  ;;  %v38_v20 = vsel %vm35_vm5, %v456_v8, %v28_v14  ;;  %v39_v21 = vsel %vm35_vm5, %v467_v15, %v29_v17 }
   0xa   :  { %355 = vmatprep.mubr.msk.f32.mxu0 %vm42_vm4, %v36_v18  ;;  %vm183_vm8 = vcmp.eq.s32.totalorder %v182_v33, 1 }
   0xb   :  { %356 = vmatmul.mubr.msk.f32.vlgmr.msra.gmra.mrb[0].mxu0 %vm42_vm4, %v37_v19 }
   0xc   :  { %358 = vmatprep.mubr.msk.f32.mxu0 %vm42_vm4, %v38_v20 }
   0xf   :  { %359 = vmatmul.mubr.msk.f32.gmra.mrb[2].mxu0 %vm42_vm4, %v39_v21 }
  0xde   :  { %v357_v23 = vpop.f32.mrb[0].mxu0 }
  0xdf   :  { %v147_v24 = vmax.f32 %v357_v23, 0.0  ;;  %v125_v25 = vpop.f32.mrb[1].mxu0 }
  0xe0   :  { %v146_v27 = vmax.f32 %v125_v25, 0.0 }
  0xe1   :  { %377 = vrsqrt.f32 %v147_v24  ;;  %vm159_vm7 = vcmp.eq.f32.partialorder %v147_v24, inf  ;;  %v162_v37 = vand.u32 2147483648, %v147_v24  ;;  %vm161_vm9 = vcmp.eq.f32.partialorder %v147_v24, 0.0 }
  0xe2   :  { %379 = vrsqrt.f32 %v146_v27  ;;  %v360_v28 = vpop.f32.mrb[2].mxu0  ;;  %vm152_vm10 = vcmp.eq.f32.partialorder %v146_v27, inf  ;;  %v155_v40 = vand.u32 2147483648, %v146_v27  ;;  %vm154_vm11 = vcmp.eq.f32.partialorder %v146_v27, 0.0 }
  0xe3   :  { %v149_v29 = vmax.f32 %v360_v28, 0.0  ;;  %v135_v30 = vpop.f32.mrb[3].mxu0 }
  0xe4   :  { %v148_v31 = vmax.f32 %v135_v30, 0.0 }
  0xe5   :  { %381 = vrsqrt.f32 %v149_v29  ;;  %vm173_vm12 = vcmp.eq.f32.partialorder %v149_v29, inf  ;;  %vm175_vm13 = vcmp.eq.f32.partialorder %v149_v29, 0.0  ;;  %v176_v50 = vand.u32 2147483648, %v149_v29 }
  0xe6   :  { %383 = vrsqrt.f32 %v148_v31  ;;  %vm166_vm14 = vcmp.eq.f32.partialorder %v148_v31, inf  ;;  %v169_v54 = vand.u32 2147483648, %v148_v31  ;;  %vm168_vm15 = vcmp.eq.f32.partialorder %v148_v31, 0.0 }
  0xeb   :  { %v378_v34 = vpop.eup %377 }
  0xec   :  { %v380_v35 = vpop.eup %379  ;;  %v158_v36 = vmul.f32 %v378_v34, %v147_v24 }
  0xed   :  { %v151_v38 = vmul.f32 %v380_v35, %v146_v27 }
  0xee   :  { %v160_v39 = vsel %vm159_vm7, %v147_v24, %v158_v36 }
  0xef   :  { %v382_v41 = vpop.eup %381  ;;  %v163_v42 = vsel %vm161_vm9, %v162_v37, %v160_v39  ;;  %v153_v43 = vsel %vm152_vm10, %v146_v27, %v151_v38 }
  0xf0   :  { %v384_v44 = vpop.eup %383  ;;  %v185_v45 = vsel %vm183_vm8, %v357_v23, %v163_v42  ;;  %v156_v46 = vsel %vm154_vm11, %v155_v40, %v153_v43  ;;  %v172_v47 = vmul.f32 %v382_v41, %v149_v29 }
  0xf1   :  { %v332_v48 = vmul.f32 -1.442695, %v185_v45  ;;  %v184_v49 = vsel %vm183_vm8, %v125_v25, %v156_v46  ;;  %v165_v51 = vmul.f32 %v384_v44, %v148_v31 }
  0xf2   :  { %v331_v52 = vmul.f32 -1.442695, %v184_v49  ;;  %v174_v53 = vsel %vm173_vm12, %v149_v29, %v172_v47 }
  0xf3   :  { %385 = vpow2.f32 %v332_v48  ;;  %v177_v55 = vsel %vm175_vm13, %v176_v50, %v174_v53  ;;  %v167_v56 = vsel %vm166_vm14, %v148_v31, %v165_v51 }
  0xf4   :  { %387 = vpow2.f32 %v331_v52  ;;  %v187_v57 = vsel %vm183_vm8, %v360_v28, %v177_v55  ;;  %v170_v58 = vsel %vm168_vm15, %v169_v54, %v167_v56 }
  0xf5   :  { %v334_v59 = vmul.f32 -1.442695, %v187_v57  ;;  %v186_v60 = vsel %vm183_vm8, %v135_v30, %v170_v58 }
  0xf6   :  { %v333_v61 = vmul.f32 -1.442695, %v186_v60 }
  0xf7   :  { %389 = vpow2.f32 %v334_v59 }
  0xf8   :  { %391 = vpow2.f32 %v333_v61 }
  0xfd   :  { %v386_v62 = vpop.eup %385 }
  0xfe   :  { %v388_v63 = vpop.eup %387  ;;  %v201_v0 = vadd.f32 1.0, %v386_v62 }
  0xff   :  { %v200_v1 = vadd.f32 1.0, %v388_v63 }
 0x101   :  { %v390_v2 = vpop.eup %389  ;;  %393 = vrcp.f32 %v200_v1 }
 0x102   :  { %v392_v3 = vpop.eup %391  ;;  %395 = vrcp.f32 %v201_v0  ;;  %v203_v5 = vadd.f32 1.0, %v390_v2 }
 0x103   :  { %v202_v6 = vadd.f32 1.0, %v392_v3 }
 0x105   :  { %397 = vrcp.f32 %v202_v6 }
 0x106   :  { %399 = vrcp.f32 %v203_v5 }
 0x10b   :  { %v394_v9 = vpop.eup %393 }
 0x10c   :  { %v396_v10 = vpop.eup %395  ;;  %363 = vmatprep.mubr.msk.f32.mxu1 %vm213_vm0, %v394_v9 }
 0x10d   :  { %364 = vmatmul.mubr.msk.f32.vlgmr.msra.gmra.mrb[0].mxu1 %vm213_vm0, %v396_v10 }
 0x10f   :  { %v398_v11 = vpop.eup %397 }
 0x110   :  { %v400_v12 = vpop.eup %399  ;;  %366 = vmatprep.mubr.msk.f32.mxu1 %vm213_vm0, %v398_v11 }
 0x111   :  { %367 = vmatmul.mubr.msk.f32.gmra.mrb[2].mxu1 %vm213_vm0, %v400_v12 }
 0x1e0   :  { %v365_v13 = vpop.f32.mrb[0].mxu1 }
 0x1e1   :  { %v315_v14 = vmul.f32 %v365_v13, %v451_v7  ;;  %v295_v16 = vpop.f32.mrb[1].mxu1 }
 0x1e2   :  { %v314_v17 = vmul.f32 %v295_v16, %v443_v4 }
 0x1e3   :  { %319 = vst.msk [vmem:[%s516_s5 + $0x8] sm:$0xff] %vm42_vm4, %v315_v14 }
 0x1e4   :  { %318 = vst.msk [vmem:[%s516_s5] sm:$0xff] %vm42_vm4, %v314_v17  ;;  %v368_v18 = vpop.f32.mrb[2].mxu1 }
 0x1e5   :  { %v317_v19 = vmul.f32 %v368_v18, %v467_v15  ;;  %v305_v20 = vpop.f32.mrb[3].mxu1 }
 0x1e6   :  { %v316_v21 = vmul.f32 %v305_v20, %v456_v8 }
 0x1e7   :  { %321 = vst.msk [vmem:[%s516_s5 + $0x18] sm:$0xff] %vm42_vm4, %v317_v19 }
 0x1e8   :  { %320 = vst.msk [vmem:[%s516_s5 + $0x10] sm:$0xff] %vm42_vm4, %v316_v21 }

</bundles_post_ra>
